<compile_context>
chip_gen: v7x
topology: tpu7x:2x2x1
jax: 0.10.0
libtpu: 0.0.40
codegen_flags: <defaults>
</compile_context>

<pallas_src>
import jax
import jax.numpy as jnp
from jax.experimental import pallas as pl
from jax.experimental.pallas import tpu as pltpu

EPS = 1e-6


def _make_kernel(F, L, eps):
    FL = F * L

    def kernel(x_ref, cent_row_ref, cent_t_ref, rep_ref, ones_ref, wbig_ref, out_ref):
        # x_ref:        (TB, F*L)  level-tiled inputs: lane l*F+f holds x[b, f]
        # cent_row_ref: (1,  F*L)  lane l*F+f holds centroid[f, l]        (resident)
        # cent_t_ref:   (L,  F)    centroid transposed                    (resident)
        # rep_ref:      (F,  F*L)  0/1 matrix: expands (TB,F) -> (TB,F*L) (resident)
        # ones_ref:     (F*L, F)   0/1 matrix: per-feature sum over L     (resident)
        # wbig_ref:     (F*L, F*E) block-diagonal embedding table, bf16   (resident)
        # out_ref:      (TB, F*E)  lane-dense output rows
        x_full = x_ref[...]                              # (TB, FL) f32
        xv = x_full[:, 0:F]                              # (TB, F): untiled x values

        # Exact per-feature softmax shift: max_l d = 1/(min_l |x-c| + EPS),
        # computed in the compact (TB, F) domain (L is tiny).
        ct = cent_t_ref[...]                             # (L, F)
        amin = jnp.abs(xv - ct[0:1, :])
        for l in range(1, L):
            amin = jnp.minimum(amin, jnp.abs(xv - ct[l:l + 1, :]))
        gmax = 1.0 / (amin + eps)                        # (TB, F), exact reciprocal

        # Broadcast the per-feature shift across its L lanes (tiny MXU matmul).
        gmax_e = jnp.dot(gmax, rep_ref[...],
                         precision=jax.lax.Precision.HIGHEST,
                         preferred_element_type=jnp.float32)       # (TB, FL)

        # Distances (exact reciprocal — do NOT approximate this one).
        d = 1.0 / (jnp.abs(x_full - cent_row_ref[...]) + eps)      # (TB, FL)
        # Clip is pure insurance: with the exact shift the bounds never bind.
        e = jnp.exp(jnp.clip(d - gmax_e, -75.0, 75.0))             # (TB, FL)

        # Per-feature denominator, approx reciprocal (EUP), broadcast back.
        s = jnp.dot(e, ones_ref[...],
                    precision=jax.lax.Precision.HIGHEST,
                    preferred_element_type=jnp.float32)            # (TB, F)
        inv = pl.reciprocal(s, approx=True)                        # (TB, F)
        inv_e = jnp.dot(inv, rep_ref[...],
                        precision=jax.lax.Precision.HIGHEST,
                        preferred_element_type=jnp.float32)        # (TB, FL)

        w = (e * inv_e).astype(jnp.bfloat16)                       # softmax weights in [0,1]
        out = jnp.dot(w, wbig_ref[...],
                      preferred_element_type=jnp.float32)          # (TB, F*E), lane-dense
        out_ref[...] = out.astype(out_ref.dtype)

    return kernel


def _default_batch_tile():
    # Half-size tiles on 64-MiB-VMEM parts (v7x class); bigger on v5e/v6e (128 MiB).
    try:
        vmem = pltpu.get_tpu_info().vmem_capacity_bytes
    except Exception:
        vmem = 128 * 2 ** 20
    return 2048 if vmem <= 64 * 2 ** 20 else 4096


def entity_embedding(x, centroid, emb_weight, *, batch_tile=None, out_dtype=jnp.float32):
    """x: (B, F), centroid: (F, L), emb_weight: (L, E) -> (B, F, E)."""
    B, F = x.shape
    Fc, L = centroid.shape
    L2, E = emb_weight.shape
    assert Fc == F and L2 == L
    FL, FE = F * L, F * E

    if batch_tile is None:
        batch_tile = _default_batch_tile()

    x = x.astype(jnp.float32)
    centroid = centroid.astype(jnp.float32)
    emb = emb_weight.astype(jnp.float32)

    # ---- batch tile selection -------------------------------------------------
    tb = min(batch_tile, B)
    if tb == B and B >= 32:
        tb = pl.cdiv(B, 4)            # keep >= 4 grid steps for pipelining / megacore
    tb = max(8, ((tb + 7) // 8) * 8)  # sublane multiple
    B_pad = pl.cdiv(B, tb) * tb
    if B_pad != B:
        # Padding rows compute finite garbage that is sliced off below.
        x = jnp.pad(x, ((0, B_pad - B), (0, 0)))

    # ---- tiny host-side constant tables ---------------------------------------
    x_tiled = jnp.tile(x, (1, L))                            # (B_pad, F*L): lane l*F+f = x[:, f]
    cent_t = centroid.T                                      # (L, F)
    cent_row = cent_t.reshape(1, FL)                         # (1, F*L): lane l*F+f = centroid[f, l]
    eye = jnp.eye(F, dtype=jnp.float32)
    rep = jnp.tile(eye, (1, L))                              # (F, F*L)   expansion matrix
    ones_mat = jnp.tile(eye, (L, 1))                         # (F*L, F)   group-sum matrix
    wbig = (emb[:, None, None, :] * eye[None, :, :, None])   # (L, F, F, E)
    wbig = wbig.reshape(FL, FE).astype(jnp.bfloat16)         # block-diagonal embedding table

    # ---- per-generation VMEM budget --------------------------------------------
    lane_pad = lambda n: ((n + 127) // 128) * 128
    x_blk = tb * lane_pad(FL) * 4
    o_blk = tb * lane_pad(FE) * 4
    need = 2 * (x_blk + o_blk) + 6 * x_blk                   # double-buffered IO + big temps
    vmem_limit = int(min(100 * 2 ** 20, max(32 * 2 ** 20, need)))

    out_bytes = jnp.dtype(out_dtype).itemsize
    cost = pl.CostEstimate(
        flops=int(2 * B_pad * FL * (FE + 3 * F)),
        transcendentals=int(B_pad * FL),
        bytes_accessed=int(B_pad * FL * 4 + B_pad * FE * out_bytes
                           + FL * FE * 2 + 3 * FL * F * 4),
    )

    kernel = _make_kernel(F, L, EPS)

    out = pl.pallas_call(
        kernel,
        out_shape=jax.ShapeDtypeStruct((B_pad, FE), out_dtype),
        grid=(B_pad // tb,),
        in_specs=[
            pl.BlockSpec((tb, FL), lambda i: (i, 0)),        # x (level-tiled)
            pl.BlockSpec((1, FL), lambda i: (0, 0)),         # centroid row (resident)
            pl.BlockSpec((L, F), lambda i: (0, 0)),          # centroid.T  (resident)
            pl.BlockSpec((F, FL), lambda i: (0, 0)),         # expansion matrix
            pl.BlockSpec((FL, F), lambda i: (0, 0)),         # group-sum matrix
            pl.BlockSpec((FL, FE), lambda i: (0, 0)),        # block-diag embedding (bf16)
        ],
        out_specs=pl.BlockSpec((tb, FE), lambda i: (i, 0)),
        compiler_params=pltpu.CompilerParams(
            dimension_semantics=("parallel",),
            vmem_limit_bytes=vmem_limit,
        ),
        cost_estimate=cost,
    )(x_tiled, cent_row, cent_t, rep, ones_mat, wbig)

    out = out.reshape(B_pad, F, E)            # free reshape -> PyTorch (B, F, E) layout
    if B_pad != B:
        out = out[:B]
    return out


def reference(x, centroid, emb_weight):
    # Pure-JAX reference mirroring the PyTorch loop (vectorized), in f32.
    d = 1.0 / (jnp.abs(x[:, :, None] - centroid[None, :, :]) + EPS)   # (B, F, L)
    w = jax.nn.softmax(d, axis=-1)
    return jnp.einsum("bfl,le->bfe", w, emb_weight)


if __name__ == "__main__":
    B, F, L, E = 8, 4, 5, 32  # batch, num features, num_level, embedding_dim

    key = jax.random.PRNGKey(0)
    kx, kc, kw, kx2 = jax.random.split(key, 4)

    x = jax.random.uniform(kx, (B, F), dtype=jnp.float32)              # input
    centroid = jax.random.uniform(kc, (F, L), dtype=jnp.float32)       # config.centroid
    emb_weight = jax.random.normal(kw, (L, E), dtype=jnp.float32)      # nn.Embedding weight

    out = entity_embedding(x, centroid, emb_weight)
    out = jax.block_until_ready(out)
    ref = reference(x, centroid, emb_weight)
    assert out.shape == (B, F, E), out.shape
    # Tolerance covers f32 compute (vs. the module's conceptual f64), bf16 MXU
    # inputs on the final (weights-in-[0,1]) matmul, and the approx EUP
    # reciprocal on the softmax denominator only (worst-case bound ~1e-2).
    assert jnp.allclose(out, ref, atol=2e-2, rtol=2e-2), "mismatch vs reference"

    # Second shape: exercises batch padding + a multi-step grid.
    B2 = 40
    x2 = jax.random.uniform(kx2, (B2, F), dtype=jnp.float32)
    out2 = jax.block_until_ready(entity_embedding(x2, centroid, emb_weight))
    ref2 = reference(x2, centroid, emb_weight)
    assert out2.shape == (B2, F, E), out2.shape
    assert jnp.allclose(out2, ref2, atol=2e-2, rtol=2e-2), "mismatch vs reference (tiled)"

    print("KERNEL_OK")
</pallas_src>

<mosaic_0001>
module attributes {stable_mosaic.version = 11 : i64} {
  func.func @kernel(%arg0: i32, %arg1: memref<8x20xf32, #tpu.memory_space<vmem>>, %arg2: memref<1x20xf32, #tpu.memory_space<vmem>>, %arg3: memref<5x4xf32, #tpu.memory_space<vmem>>, %arg4: memref<4x20xf32, #tpu.memory_space<vmem>>, %arg5: memref<20x4xf32, #tpu.memory_space<vmem>>, %arg6: memref<20x128xbf16, #tpu.memory_space<vmem>>, %arg7: memref<8x128xf32, #tpu.memory_space<vmem>>) attributes {dimension_semantics = [#tpu.dimension_semantics<parallel>], iteration_bounds = array<i64: 1>, scalar_prefetch = 0 : i64, scratch_operands = 0 : i64, tpu.core_type = #tpu.core_type<tc>, window_params = [{transform_indices = @transform_0, window_bounds = array<i64: 8, 20>}, {pipeline_mode = #tpu.pipeline_mode<synchronous>, transform_indices = @transform_1, window_bounds = array<i64: 1, 20>}, {pipeline_mode = #tpu.pipeline_mode<synchronous>, transform_indices = @transform_2, window_bounds = array<i64: 5, 4>}, {pipeline_mode = #tpu.pipeline_mode<synchronous>, transform_indices = @transform_3, window_bounds = array<i64: 4, 20>}, {pipeline_mode = #tpu.pipeline_mode<synchronous>, transform_indices = @transform_4, window_bounds = array<i64: 20, 4>}, {pipeline_mode = #tpu.pipeline_mode<synchronous>, transform_indices = @transform_5, window_bounds = array<i64: 20, 128>}, {transform_indices = @transform_6, window_bounds = array<i64: 8, 128>}]} {
    %c0 = arith.constant 0 : index
    %c0_0 = arith.constant 0 : index
    %0 = vector.load %arg1[%c0, %c0_0] : memref<8x20xf32, #tpu.memory_space<vmem>>, vector<8x20xf32>
    %1 = vector.extract_strided_slice %0 {offsets = [0, 0], sizes = [8, 4], strides = [1, 1]} : vector<8x20xf32> to vector<8x4xf32>
    %c0_1 = arith.constant 0 : index
    %c0_2 = arith.constant 0 : index
    %2 = vector.load %arg3[%c0_1, %c0_2] : memref<5x4xf32, #tpu.memory_space<vmem>>, vector<5x4xf32>
    %3 = vector.extract_strided_slice %2 {offsets = [0, 0], sizes = [1, 4], strides = [1, 1]} : vector<5x4xf32> to vector<1x4xf32>
    %4 = vector.broadcast %3 : vector<1x4xf32> to vector<8x4xf32>
    %5 = arith.subf %1, %4 : vector<8x4xf32>
    %6 = math.absf %5 : vector<8x4xf32>
    %7 = vector.extract_strided_slice %2 {offsets = [1, 0], sizes = [1, 4], strides = [1, 1]} : vector<5x4xf32> to vector<1x4xf32>
    %8 = vector.broadcast %7 : vector<1x4xf32> to vector<8x4xf32>
    %9 = arith.subf %1, %8 : vector<8x4xf32>
    %10 = math.absf %9 : vector<8x4xf32>
    %11 = arith.minimumf %6, %10 : vector<8x4xf32>
    %12 = vector.extract_strided_slice %2 {offsets = [2, 0], sizes = [1, 4], strides = [1, 1]} : vector<5x4xf32> to vector<1x4xf32>
    %13 = vector.broadcast %12 : vector<1x4xf32> to vector<8x4xf32>
    %14 = arith.subf %1, %13 : vector<8x4xf32>
    %15 = math.absf %14 : vector<8x4xf32>
    %16 = arith.minimumf %11, %15 : vector<8x4xf32>
    %17 = vector.extract_strided_slice %2 {offsets = [3, 0], sizes = [1, 4], strides = [1, 1]} : vector<5x4xf32> to vector<1x4xf32>
    %18 = vector.broadcast %17 : vector<1x4xf32> to vector<8x4xf32>
    %19 = arith.subf %1, %18 : vector<8x4xf32>
    %20 = math.absf %19 : vector<8x4xf32>
    %21 = arith.minimumf %16, %20 : vector<8x4xf32>
    %22 = vector.extract_strided_slice %2 {offsets = [4, 0], sizes = [1, 4], strides = [1, 1]} : vector<5x4xf32> to vector<1x4xf32>
    %23 = vector.broadcast %22 : vector<1x4xf32> to vector<8x4xf32>
    %24 = arith.subf %1, %23 : vector<8x4xf32>
    %25 = math.absf %24 : vector<8x4xf32>
    %26 = arith.minimumf %21, %25 : vector<8x4xf32>
    %cst = arith.constant 9.99999997E-7 : f32
    %27 = vector.broadcast %cst : f32 to vector<8x4xf32>
    %28 = arith.addf %26, %27 : vector<8x4xf32>
    %cst_3 = arith.constant 1.000000e+00 : f32
    %29 = vector.broadcast %cst_3 : f32 to vector<8x4xf32>
    %30 = arith.divf %29, %28 : vector<8x4xf32>
    %c0_4 = arith.constant 0 : index
    %c0_5 = arith.constant 0 : index
    %31 = vector.load %arg4[%c0_4, %c0_5] : memref<4x20xf32, #tpu.memory_space<vmem>>, vector<4x20xf32>
    %cst_6 = arith.constant dense<0.000000e+00> : vector<8x20xf32>
    %32 = tpu.matmul %30, %31, %cst_6 {dimension_numbers = #tpu.dot_dimension_numbers<[1], [0], [0], [1], [0, 0, 1, 1], [], []>, precision = #tpu.contract_precision<fp32>} : vector<8x4xf32>, vector<4x20xf32>, vector<8x20xf32> -> vector<8x20xf32>
    %c0_7 = arith.constant 0 : index
    %c0_8 = arith.constant 0 : index
    %33 = vector.load %arg2[%c0_7, %c0_8] : memref<1x20xf32, #tpu.memory_space<vmem>>, vector<1x20xf32>
    %34 = vector.broadcast %33 : vector<1x20xf32> to vector<8x20xf32>
    %35 = arith.subf %0, %34 : vector<8x20xf32>
    %36 = math.absf %35 : vector<8x20xf32>
    %cst_9 = arith.constant 9.99999997E-7 : f32
    %37 = vector.broadcast %cst_9 : f32 to vector<8x20xf32>
    %38 = arith.addf %36, %37 : vector<8x20xf32>
    %cst_10 = arith.constant 1.000000e+00 : f32
    %39 = vector.broadcast %cst_10 : f32 to vector<8x20xf32>
    %40 = arith.divf %39, %38 : vector<8x20xf32>
    %41 = arith.subf %40, %32 : vector<8x20xf32>
    %cst_11 = arith.constant -7.500000e+01 : f32
    %cst_12 = arith.constant 7.500000e+01 : f32
    %42 = vector.broadcast %cst_11 : f32 to vector<8x20xf32>
    %43 = arith.maximumf %42, %41 : vector<8x20xf32>
    %44 = vector.broadcast %cst_12 : f32 to vector<8x20xf32>
    %45 = arith.minimumf %44, %43 : vector<8x20xf32>
    %46 = math.exp %45 : vector<8x20xf32>
    %c0_13 = arith.constant 0 : index
    %c0_14 = arith.constant 0 : index
    %47 = vector.load %arg5[%c0_13, %c0_14] : memref<20x4xf32, #tpu.memory_space<vmem>>, vector<20x4xf32>
    %cst_15 = arith.constant dense<0.000000e+00> : vector<8x4xf32>
    %48 = tpu.matmul %46, %47, %cst_15 {dimension_numbers = #tpu.dot_dimension_numbers<[1], [0], [0], [1], [0, 0, 1, 1], [], []>, precision = #tpu.contract_precision<fp32>} : vector<8x20xf32>, vector<20x4xf32>, vector<8x4xf32> -> vector<8x4xf32>
    %49 = tpu.reciprocal %48 {approx = true} : vector<8x4xf32> -> vector<8x4xf32>
    %c0_16 = arith.constant 0 : index
    %c0_17 = arith.constant 0 : index
    %50 = vector.load %arg4[%c0_16, %c0_17] : memref<4x20xf32, #tpu.memory_space<vmem>>, vector<4x20xf32>
    %cst_18 = arith.constant dense<0.000000e+00> : vector<8x20xf32>
    %51 = tpu.matmul %49, %50, %cst_18 {dimension_numbers = #tpu.dot_dimension_numbers<[1], [0], [0], [1], [0, 0, 1, 1], [], []>, precision = #tpu.contract_precision<fp32>} : vector<8x4xf32>, vector<4x20xf32>, vector<8x20xf32> -> vector<8x20xf32>
    %52 = arith.mulf %46, %51 : vector<8x20xf32>
    %53 = arith.truncf %52 : vector<8x20xf32> to vector<8x20xbf16>
    %c0_19 = arith.constant 0 : index
    %c0_20 = arith.constant 0 : index
    %54 = vector.load %arg6[%c0_19, %c0_20] : memref<20x128xbf16, #tpu.memory_space<vmem>>, vector<20x128xbf16>
    %cst_21 = arith.constant dense<0.000000e+00> : vector<8x128xf32>
    %55 = tpu.matmul %53, %54, %cst_21 {dimension_numbers = #tpu.dot_dimension_numbers<[1], [0], [0], [1], [0, 0, 1, 1], [], []>} : vector<8x20xbf16>, vector<20x128xbf16>, vector<8x128xf32> -> vector<8x128xf32>
    %c0_22 = arith.constant 0 : index
    %c0_23 = arith.constant 0 : index
    %56 = vector.load %arg7[%c0_22, %c0_23] : memref<8x128xf32, #tpu.memory_space<vmem>>, vector<8x128xf32>
    tpu.vector_store %arg7[%c0_22, %c0_23], %55 {strides = array<i32>} : memref<8x128xf32, #tpu.memory_space<vmem>>, vector<8x128xf32>,
    return
  }
  func.func @transform_0(%arg0: i32) -> (i32, i32) {
    %c0_i32 = arith.constant 0 : i32
    %c0_i32_0 = arith.constant 0 : i32
    return %arg0, %c0_i32 : i32, i32
  }
  func.func @transform_1(%arg0: i32) -> (i32, i32) {
    %c0_i32 = arith.constant 0 : i32
    %c0_i32_0 = arith.constant 0 : i32
    %c0_i32_1 = arith.constant 0 : i32
    return %c0_i32, %c0_i32_0 : i32, i32
  }
  func.func @transform_2(%arg0: i32) -> (i32, i32) {
    %c0_i32 = arith.constant 0 : i32
    %c0_i32_0 = arith.constant 0 : i32
    %c0_i32_1 = arith.constant 0 : i32
    return %c0_i32, %c0_i32_0 : i32, i32
  }
  func.func @transform_3(%arg0: i32) -> (i32, i32) {
    %c0_i32 = arith.constant 0 : i32
    %c0_i32_0 = arith.constant 0 : i32
    %c0_i32_1 = arith.constant 0 : i32
    return %c0_i32, %c0_i32_0 : i32, i32
  }
  func.func @transform_4(%arg0: i32) -> (i32, i32) {
    %c0_i32 = arith.constant 0 : i32
    %c0_i32_0 = arith.constant 0 : i32
    %c0_i32_1 = arith.constant 0 : i32
    return %c0_i32, %c0_i32_0 : i32, i32
  }
  func.func @transform_5(%arg0: i32) -> (i32, i32) {
    %c0_i32 = arith.constant 0 : i32
    %c0_i32_0 = arith.constant 0 : i32
    %c0_i32_1 = arith.constant 0 : i32
    return %c0_i32, %c0_i32_0 : i32, i32
  }
  func.func @transform_6(%arg0: i32) -> (i32, i32) {
    %c0_i32 = arith.constant 0 : i32
    %c0_i32_0 = arith.constant 0 : i32
    return %arg0, %c0_i32 : i32, i32
  }
}

</mosaic_0001>

<bundles_post_ra>
// kernel: tpu_custom_call.1
= control target key start
LH: loop header
LB: loop body
LE: loop exit
PB: predicated region body
PF: predicated region fallthrough
CT: control target
= control target key end

     0   :  { %vm69_vm0 = vcmask 1043456   ;;  %v27_v1 = vlaneseq  ;;  %v1808_v2 = vmov 0.0   ;;  %vm1809_vm1 = vmmov 0   ;;  %s2003_s0 = inlined_call_operand.vmem [shape: f32[8,20], index: 0, kind: input, shape index: {}]   ;;  %s2004_s1 = inlined_call_operand.vmem [shape: f32[1,20], index: 1, kind: input, shape index: {}]   ;;  %s2005_s2 = inlined_call_operand.vmem [shape: f32[5,4], index: 2, kind: input, shape index: {}]   ;;  %s2006_s3 = inlined_call_operand.vmem [shape: f32[4,20], index: 3, kind: input, shape index: {}]   ;;  %s2007_s4 = inlined_call_operand.vmem [shape: f32[20,4], index: 4, kind: input, shape index: {}]   ;;  %s2008_s5 = inlined_call_operand.vmem [shape: bf16[20,128], index: 5, kind: input, shape index: {}]   ;;  %s2009_s6 = inlined_call_operand.hbm [shape: f32[8,128], index: 6, kind: output, shape index: {}]  }
   0x1   :  { %v64_v0 = vld [vmem:[%s2006_s3] sm:$0xf]  ;;  %1600 = vmatprep.subr.mxu0 %v1808_v2  ;;  %1602 = vmatprep.mubr.msk.f32.mxu0 %vm1809_vm1, %v1808_v2 }
   0x2   :  { %v71_v3 = vsel %vm69_vm0, %v64_v0, 0  ;;  %v28_v5 = vshrl.u32 %v27_v1, 7  ;;  %1636 = vmatprep.mubr.msk.f32.mxu1 %vm1809_vm1, %v1808_v2  ;;  %v26_v6 = vld [vmem:[%s2005_s2] sm:$0x1f] }
   0x3   :  { %v1854_v4 = vand.u32 4294901760, %v71_v3 }
   0x4   :  { %11 = vsyncpa [#allocation3], 0  ;;  %v29_v7 = vsub.s32 0, %v28_v5  ;;  %v35_v8 = vsub.s32 1, %v28_v5  ;;  %v42_v9 = vsub.s32 2, %v28_v5  ;;  %v49_v10 = vsub.s32 3, %v28_v5 }
   0x5   :  { %1601 = vmatpush3.msra.mxu0 %v1854_v4  ;;  %v1866_v11 = vld [vmem:[%s2003_s0] sm:$0xff]  ;;  %v56_v12 = vsub.s32 4, %v28_v5  ;;  %v1874_v33 = vsub.f32 %v71_v3, %v1854_v4  ;;  %vm65_vm2 = vcmask 31744   ;;  %v537_v45 = vld [vmem:[%s2007_s4 + $0x8] sm:$0xff]  ;;  %v538_v46 = vld [vmem:[%s2007_s4 + $0x10] sm:$0xf] }
   0x6   :  { %1605 = vmatprep.subr.mxu0 %v1808_v2  ;;  %v30_v13 = vrot.slane %v26_v6, %v29_v7  ;;  %v36_v14 = vrot.slane %v26_v6, %v35_v8  ;;  %v43_v15 = vrot.slane %v26_v6, %v42_v9  ;;  %v50_v16 = vrot.slane %v26_v6, %v49_v10  ;;  %v536_v44 = vld [vmem:[%s2007_s4] sm:$0xff]  ;;  %s1811_s10 = smov [#allocation2]  }
   0x7   :  { %v57_v17 = vrot.slane %v26_v6, %v56_v12  ;;  %v1878_v36 = vand.u32 4294901760, %v1874_v33  ;;  %v1810_v47 = vmov 0.0|0.0   ;;  %v547_v48 = vand.u32 4294901760, %v536_v44  ;;  %v1544_v0 = vld [vmem:[%s2004_s1] ss:$0 sm:$0xff]  ;;  %s1536_s11 = sshll.u32 %s1811_s10, 4  ;;  %s1537_s11 = int_to_ptr.vmem [resolvable:$true] %s1536_s11 }
   0x8   :  { %v31_v18 = vsub.f32 %v1866_v11, %v30_v13  ;;  %v37_v19 = vsub.f32 %v1866_v11, %v36_v14  ;;  %v44_v20 = vsub.f32 %v1866_v11, %v43_v15  ;;  %v51_v21 = vsub.f32 %v1866_v11, %v50_v16  ;;  %1722 = vmatprep.subr.bf16.mxu1 %v1810_v47  ;;  %s1784_s12 = scalar_lea.vmem %s1537_s11, 128  ;;  %p1789_p1 = scmp.lt.s32.totalorder %s1537_s11, %s1537_s11 }
   0x9   :  { %v58_v25 = vsub.f32 %v1866_v11, %v57_v17  ;;  %v153_v39 = vsub.f32 %v1874_v33, %v1878_v36  ;;  %v550_v49 = vand.u32 4294901760, %v537_v45  ;;  %v544_v50 = vsel %vm69_vm0, %v538_v46, 0  ;;  %p1785_p0 = scmp.ne.s32.totalorder %s1537_s11, %s1784_s12  ;;  %p1790_p2 = scmp.lt.s32.totalorder %s1784_s12, %s1784_s12 }
   0xa   :  { %v32_v22 = vand.u32 2147483647, %v31_v18  ;;  %v38_v23 = vand.u32 2147483647, %v37_v19  ;;  %v45_v24 = vand.u32 2147483647, %v44_v20  ;;  %v626_v52 = vsub.f32 %v536_v44, %v547_v48 }
   0xb   :  { %v52_v27 = vand.u32 2147483647, %v51_v21  ;;  %v59_v29 = vand.u32 2147483647, %v58_v25  ;;  %v1882_v42 = vand.u32 4294901760, %v153_v39  ;;  %v1919_v51 = vpack.c.bf16 %v550_v49, %v547_v48  ;;  %p1791_p3 = por %p1790_p2, %p1789_p1 }
   0xc   :  { %v39_v26 = vmin.f32 %v32_v22, %v38_v23  ;;  %v633_v53 = vsub.f32 %v537_v45, %v550_v49  ;;  %v1922_v54 = vand.u32 4294901760, %v544_v50  ;;  %v627_v55 = vand.u32 4294901760, %v626_v52  ;;  %v1774_v23 = vld [vmem:[%s2008_s5] sm:$0xff]  }
   0xd   :  { %1724 = vmatpush3.bf16.msra.mxu1 %v1919_v51  ;;  %v526_v1 = vsub.f32 %v1866_v11, %v1544_v0  ;;  %vm539_vm3 = vcmask 162816   ;;  %vm1485_vm4 = vcmask 1041408   ;;  %p1792_p4 = pnand %p1791_p3, %p1785_p0 }
   0xe   :  { %v46_v28 = vmin.f32 %v39_v26, %v45_v24  ;;  %1634 = vmatprep.subr.mxu1 %v1808_v2  ;;  %v634_v56 = vand.u32 4294901760, %v633_v53  ;;  %v628_v57 = vsub.f32 %v626_v52, %v627_v55  ;;  %v1729_v62 = vpack.c.bf16 %v633_v53, %v626_v52 }
   0xf   :  { %v527_v3 = vand.u32 2147483647, %v526_v1  ;;  %v640_v14 = vsub.f32 %v544_v50, %v1922_v54 }
  0x10   :  { %v53_v30 = vmin.f32 %v46_v28, %v52_v27  ;;  %v635_v58 = vsub.f32 %v633_v53, %v634_v56  ;;  %v629_v59 = vand.u32 4294901760, %v628_v57  ;;  %v1735_v63 = vpack.c.bf16 %v634_v56, %v627_v55 }
  0x11   :  { %1635 = vmatpush3.msra.mxu1 %v1922_v54  ;;  %v528_v5 = vadd.f32 1e-06, %v527_v3  ;;  %v641_v17 = vand.u32 4294901760, %v640_v14 }
  0x12   :  { %v60_v31 = vmin.f32 %v53_v30, %v59_v29  ;;  %1725 = vmatprep.subr.bf16.mxu1 %v1810_v47  ;;  %v636_v60 = vand.u32 4294901760, %v635_v58 }
  0x13   :  { %v642_v20 = vsub.f32 %v640_v14, %v641_v17 }
  0x14   :  { %v61_v32 = vadd.f32 1e-06, %v60_v31  ;;  %v1726_v61 = vpack.c.bf16 %v636_v60, %v629_v59 }
  0x15   :  { %v643_v22 = vand.u32 4294901760, %v642_v20 }
  0x16   :  { %1776 = vrcp.f32 %v61_v32 }
  0x17   :  { %1778 = vrcp.f32 %v528_v5 }
  0x20   :  { %v1777_v34 = vpop.eup %1776 }
  0x21   :  { %v67_v35 = vsel %vm65_vm2, %v1777_v34, 0  ;;  %v1779_v6 = vpop.eup %1778 }
  0x22   :  { %v139_v37 = vand.u32 4294901760, %v67_v35 }
  0x24   :  { %v140_v38 = vsub.f32 %v67_v35, %v139_v37 }
  0x26   :  { %v141_v40 = vand.u32 4294901760, %v140_v38 }
  0x28   :  { %v142_v41 = vsub.f32 %v140_v38, %v141_v40 }
  0x2a   :  { %v143_v43 = vand.u32 4294901760, %v142_v41 }
  0x2c   :  { %1603 = vmatmul.mubr.f32.vlgmr.msra.gmra.mrb[0].mxu0 %v143_v43 }
  0x2d   :  { %1606 = vmatpush3.msra.mxu0 %v1882_v42  ;;  %1607 = vmatprep.mubr.msk.f32.mxu0 %vm1809_vm1, %v1808_v2 }
  0x2e   :  { %1610 = vmatprep.subr.mxu0 %v1808_v2 }
  0x34   :  { %1608 = vmatmul.mubr.f32.vlgmr.msra.gmra.mrb[0].mxu0 %v139_v37 }
  0x35   :  { %1611 = vmatpush3.msra.mxu0 %v1874_v33  ;;  %1612 = vmatprep.mubr.msk.f32.mxu0 %vm1809_vm1, %v1808_v2 }
  0x36   :  { %1615 = vmatprep.subr.mxu0 %v1808_v2 }
  0x3c   :  { %1613 = vmatmul.mubr.f32.vlgmr.msra.gmra.mrb[0].mxu0 %v140_v38 }
  0x3d   :  { %1616 = vmatpush3.msra.mxu0 %v1854_v4  ;;  %1617 = vmatprep.mubr.msk.f32.mxu0 %vm1809_vm1, %v1808_v2 }
  0x3e   :  { %1620 = vmatprep.subr.mxu0 %v1808_v2 }
  0x44   :  { %1618 = vmatmul.mubr.f32.vlgmr.msra.gmra.mrb[0].mxu0 %v141_v40 }
  0x45   :  { %1621 = vmatpush3.msra.mxu0 %v1878_v36  ;;  %1622 = vmatprep.mubr.msk.f32.mxu0 %vm1809_vm1, %v1808_v2 }
  0x46   :  { %1625 = vmatprep.subr.mxu0 %v1808_v2 }
  0x4c   :  { %1623 = vmatmul.mubr.f32.vlgmr.msra.gmra.mrb[0].mxu0 %v139_v37 }
  0x4d   :  { %1626 = vmatpush3.msra.mxu0 %v1854_v4  ;;  %1627 = vmatprep.mubr.msk.f32.mxu0 %vm1809_vm1, %v1808_v2 }
  0x4e   :  { %1684 = vmatprep.subr.mxu0 %v1808_v2 }
  0x54   :  { %1628 = vmatmul.mubr.f32.vlgmr.msra.gmra.mrb[0].mxu0 %v139_v37 }
  0x55   :  { %1685 = vmatpush3.msra.mxu0 %v1854_v4  ;;  %1686 = vmatprep.mubr.msk.f32.mxu0 %vm1809_vm1, %v1808_v2 }
  0x56   :  { %1689 = vmatprep.subr.mxu0 %v1808_v2 }
 0x127   :  { %v515_v7 = vpop.f32.mrb[0].mxu0 }
 0x128   :  { %v531_v8 = vsub.f32 %v1779_v6, %v515_v7  ;;  %v1629_v9 = vpop.f32.mrb[1].mxu0 }
 0x12a   :  { %v1545_v10 = vclamps-f32 %v531_v8, 75.0 }
 0x12c   :  { %v534_v12 = vmul.f32 1.442695, %v1545_v10 }
 0x12e   :  { %1780 = vpow2.f32 %v534_v12 }
 0x138   :  { %v1931_v13 = vpop.eup %1780 }
 0x139   :  { %v541_v15 = vsel %vm539_vm3, %v1931_v13, 0 }
 0x13a   :  { %v614_v16 = vand.u32 4294901760, %v541_v15 }
 0x13c   :  { %v615_v11 = vsub.f32 %v541_v15, %v614_v16 }
 0x13e   :  { %v616_v18 = vand.u32 4294901760, %v615_v11 }
 0x140   :  { %v617_v19 = vsub.f32 %v615_v11, %v616_v18 }
 0x142   :  { %v618_v21 = vand.u32 4294901760, %v617_v19 }
 0x144   :  { %1637 = vmatmul.mubr.f32.vlgmr.msra.gmra.mrb[0].mxu1 %v618_v21 }
 0x145   :  { %1727 = vmatpush3.bf16.msra.mxu1 %v1726_v61  ;;  %1645 = vmatprep.mubr.msk.f32.mxu1 %vm1809_vm1, %v1808_v2 }
 0x146   :  { %1643 = vmatprep.subr.mxu1 %v1808_v2 }
 0x149   :  { %1644 = vmatpush3.msra.mxu1 %v643_v22 }
 0x14a   :  { %1728 = vmatprep.subr.bf16.mxu1 %v1810_v47 }
 0x14c   :  { %1646 = vmatmul.mubr.f32.vlgmr.msra.gmra.mrb[0].mxu1 %v614_v16 }
 0x14d   :  { %1730 = vmatpush3.bf16.msra.mxu1 %v1729_v62  ;;  %1654 = vmatprep.mubr.msk.f32.mxu1 %vm1809_vm1, %v1808_v2 }
 0x14e   :  { %1652 = vmatprep.subr.mxu1 %v1808_v2 }
 0x151   :  { %1653 = vmatpush3.msra.mxu1 %v640_v14 }
 0x152   :  { %1731 = vmatprep.subr.bf16.mxu1 %v1810_v47 }
 0x154   :  { %1655 = vmatmul.mubr.f32.vlgmr.msra.gmra.mrb[0].mxu1 %v615_v11 }
 0x155   :  { %1733 = vmatpush3.bf16.msra.mxu1 %v1919_v51  ;;  %1663 = vmatprep.mubr.msk.f32.mxu1 %vm1809_vm1, %v1808_v2 }
 0x156   :  { %1661 = vmatprep.subr.mxu1 %v1808_v2 }
 0x159   :  { %1662 = vmatpush3.msra.mxu1 %v1922_v54 }
 0x15a   :  { %1734 = vmatprep.subr.bf16.mxu1 %v1810_v47 }
 0x15c   :  { %1664 = vmatmul.mubr.f32.vlgmr.msra.gmra.mrb[0].mxu1 %v616_v18 }
 0x15d   :  { %1736 = vmatpush3.bf16.msra.mxu1 %v1735_v63  ;;  %1672 = vmatprep.mubr.msk.f32.mxu1 %vm1809_vm1, %v1808_v2 }
 0x15e   :  { %1670 = vmatprep.subr.mxu1 %v1808_v2 }
 0x161   :  { %1671 = vmatpush3.msra.mxu1 %v641_v17 }
 0x162   :  { %1737 = vmatprep.subr.bf16.mxu1 %v1810_v47 }
 0x164   :  { %1673 = vmatmul.mubr.f32.vlgmr.msra.gmra.mrb[0].mxu1 %v614_v16 }
 0x165   :  { %1739 = vmatpush3.bf16.msra.mxu1 %v1919_v51  ;;  %1681 = vmatprep.mubr.msk.f32.mxu1 %vm1809_vm1, %v1808_v2 }
 0x166   :  { %1679 = vmatprep.subr.mxu1 %v1808_v2 }
 0x169   :  { %1680 = vmatpush3.msra.mxu1 %v1922_v54 }
 0x16a   :  { %1714 = vmatprep.subr.bf16.mxu1 %v1808_v2 }
 0x16c   :  { %1682 = vmatmul.mubr.f32.vlgmr.msra.gmra.mrb[0].mxu1 %v614_v16 }
 0x16d   :  { %1718 = vmatprep.mubr.msk.bf16.mxu1 %vm1809_vm1, %v1808_v2  ;;  %1715 = vmatpush3.bf16.msra.mxu1 %v1774_v23 }
 0x16e   :  { %1716 = vmatprep.subr.bf16.mxu1 %v1808_v2 }
 0x23f   :  { %v1014_v24 = vpop.f32.mrb[0].mxu1 }
 0x240   :  { %1782 = vrcp.f32 %v1014_v24  ;;  %v1683_v25 = vpop.f32.mrb[1].mxu1 }
 0x24a   :  { %v1783_v26 = vpop.eup %1782 }
 0x24b   :  { %v1020_v27 = vsel %vm65_vm2, %v1783_v26, 0 }
 0x24c   :  { %v1088_v28 = vand.u32 4294901760, %v1020_v27 }
 0x24e   :  { %v1089_v29 = vsub.f32 %v1020_v27, %v1088_v28 }
 0x250   :  { %v1090_v30 = vand.u32 4294901760, %v1089_v29 }
 0x252   :  { %v1091_v31 = vsub.f32 %v1089_v29, %v1090_v30 }
 0x254   :  { %v1092_v32 = vand.u32 4294901760, %v1091_v31 }
 0x256   :  { %1687 = vmatmul.mubr.f32.vlgmr.msra.gmra.mrb[2].mxu0 %v1092_v32 }
 0x257   :  { %1690 = vmatpush3.msra.mxu0 %v1882_v42  ;;  %1691 = vmatprep.mubr.msk.f32.mxu0 %vm1809_vm1, %v1808_v2 }
 0x258   :  { %1694 = vmatprep.subr.mxu0 %v1808_v2 }
 0x25e   :  { %1692 = vmatmul.mubr.f32.vlgmr.msra.gmra.mrb[2].mxu0 %v1088_v28 }
 0x25f   :  { %1695 = vmatpush3.msra.mxu0 %v1874_v33  ;;  %1696 = vmatprep.mubr.msk.f32.mxu0 %vm1809_vm1, %v1808_v2  ;;  %v1775_v33 = vld [vmem:[%s2008_s5 + $0x8] ss:$0 sps:$4 sm:$0x33]  }
 0x260   :  { %1699 = vmatprep.subr.mxu0 %v1808_v2  ;;  %v1487_v34 = vsel %vm1485_vm4, %v1775_v33, 0 }
 0x261   :  { %1717 = vmatpush3.bf16.msra.mxu1 %v1487_v34 }
 0x266   :  { %1697 = vmatmul.mubr.f32.vlgmr.msra.gmra.mrb[2].mxu0 %v1089_v29 }
 0x267   :  { %1700 = vmatpush3.msra.mxu0 %v1854_v4  ;;  %1701 = vmatprep.mubr.msk.f32.mxu0 %vm1809_vm1, %v1808_v2 }
 0x268   :  { %1704 = vmatprep.subr.mxu0 %v1808_v2 }
 0x26e   :  { %1702 = vmatmul.mubr.f32.vlgmr.msra.gmra.mrb[2].mxu0 %v1090_v30 }
 0x26f   :  { %1705 = vmatpush3.msra.mxu0 %v1878_v36  ;;  %1706 = vmatprep.mubr.msk.f32.mxu0 %vm1809_vm1, %v1808_v2 }
 0x270   :  { %1709 = vmatprep.subr.mxu0 %v1808_v2 }
 0x276   :  { %1707 = vmatmul.mubr.f32.vlgmr.msra.gmra.mrb[2].mxu0 %v1088_v28 }
 0x277   :  { %1710 = vmatpush3.msra.mxu0 %v1854_v4  ;;  %1711 = vmatprep.mubr.msk.f32.mxu0 %vm1809_vm1, %v1808_v2 }
 0x27e   :  { %1712 = vmatmul.mubr.f32.vlgmr.msra.gmra.mrb[2].mxu0 %v1088_v28 }
 0x351   :  { %v1464_v35 = vpop.f32.mrb[2].mxu0 }
 0x352   :  { %v1468_v36 = vmul.f32 %v1931_v13, %v1464_v35  ;;  %v1713_v37 = vpop.f32.mrb[3].mxu0 }
 0x354   :  { %v1469_v38 = vpack.c.bf16 %v1468_v36, %v1468_v36 }
 0x356   :  { %1719 = vmatmul.mubr.msk.bf16.vlgmr.msra.gmra.mrb[4].mxu1 %vm539_vm3, %v1469_v38 }
 0x429   :  { %v1523_v4 = vpop.f32.mrb[4].mxu1 }
 0x42a   :  { %1529 = vst [vmem:[#allocation2] sm:$0xff] %v1523_v4  ;;  %v1720_v2 = vpop.f32.mrb[5].mxu1 }
 0x42b   :  { %v1526_v39 = vpop.f32.mrb[6].mxu1 }
 0x42c   :  { %1795 = shalt.err (!%p1792_p4)
}
 0x42d   :  { %s1796_s14 = scalar_lea.hbm %s2009_s6, 128 }
 0x42e   :  { %p1797_p5 = scmp.ne.s32.totalorder %s2009_s6, %s1796_s14  ;;  %p1800_p6 = scmp.lt.u32.totalorder %s1796_s14, %s2009_s6 }
 0x430   :  { %p1802_p7 = pnand %p1800_p6, %p1797_p5 }
 0x432   :  { %1805 = shalt.err (!%p1802_p7)
}
 0x433   :  { %1539 = dma.vmem_to_hbm [thread:$0]  %s1537_s11, 128, %s2009_s6, [#allocation3]   ;;  %v1721_v40 = vpop.f32.mrb[7].mxu1 }
 0x434   :  { %1806 = dma.done.wait [#allocation3], 128  }
 0x435   :  { %1807 = vsyncadd [#allocation3], 4294967168 }
 0x436   :  { %1543 = vsyncpa [#allocation3], 1 }

</bundles_post_ra>
